<compile_context>
chip_gen: v6e
topology: v6e:2x2x1
jax: 0.10.0
libtpu: 0.0.40
codegen_flags: <defaults>
</compile_context>

<pallas_src>
import jax
import jax.numpy as jnp
from jax.experimental import pallas as pl
from jax.experimental.pallas import tpu as pltpu

B = 256          # batch (2 tiles of TM) -- exercises the batch grid
D_IN = 256       # input feature dim
H = 128          # encoder hidden dim
Z2 = 128         # encoder output dim (2 * latent 64)
Z = 64           # latent (mu) dim
TM = 128         # batch tile: >=2 parallel steps at B=256 for v7x;
                 # raise to 256-1024 on single-TC v5e/v6e for fewer steps
OUT_LANES = 128  # lane width of the fused-weight slab (col 0 carries data)
OUT_SUBLANES = 8 # output block sublane depth (keeps (8,128)-aligned stores)


def supervised_vae_kernel(x_ref, w1_ref, b1_ref, wf_ref, bf_ref, o_ref):
    # encoder layer 1: in-kernel bf16 cast of x (free VPU op), MXU matmul,
    # f32 accumulation; bias-add / ReLU epilogue in f32.
    h = jnp.dot(x_ref[...].astype(jnp.bfloat16), w1_ref[...],
                preferred_element_type=jnp.float32)
    h = jnp.maximum(h + b1_ref[...], 0.0)
    # fused (encoder layer 2 [:, :64]  +  regressor) matmul, kept in f32 for
    # accuracy (mem-bound kernel -> the f32 MXU passes are free).
    r = jnp.dot(h, wf_ref[...], preferred_element_type=jnp.float32) + bf_ref[...]
    # Lane-dense writeback: only column 0 of r is real.  Transpose (XLU slot,
    # free in a mem-bound kernel) and store the top 8 sublanes; rows 1..7 are
    # exact zeros (wf/bf padding).  16x less HBM writeback than the old slab.
    o_ref[...] = jnp.transpose(r)[0:OUT_SUBLANES, :]


def fuse_params(params):
    """One-time parameter preprocessing (keep OUT of the per-call hot path)."""
    w1, b1, w2, b2, wr, br = params
    # Algebraic fold of (layer-2 slice [:, :64] + regressor) into one matmul.
    wf = w2[:, :Z] @ wr                              # (H, 1) f32
    bf = b2[:, :Z] @ wr + br                         # (1, 1) f32
    # Pad to a lane-dense 128-wide slab (only column 0 carries data).
    wf_pad = jnp.zeros((H, OUT_LANES), jnp.float32).at[:, :1].set(wf)
    bf_pad = jnp.zeros((1, OUT_LANES), jnp.float32).at[:, :1].set(bf)
    w1_bf = w1.astype(jnp.bfloat16)                  # bf16 MXU operand
    return w1_bf, b1, wf_pad, bf_pad


def supervised_vae_forward(x, fused_params):
    w1_bf, b1, wf_pad, bf_pad = fused_params

    n_rows = x.shape[0]
    pad = (-n_rows) % TM
    if pad:
        # Cold path only (B not a multiple of TM); avoided for B=256/TM=128.
        x = jnp.pad(x, ((0, pad), (0, 0)))
    m_pad = n_rows + pad
    n_tiles = m_pad // TM

    out = pl.pallas_call(
        supervised_vae_kernel,
        out_shape=jax.ShapeDtypeStruct((OUT_SUBLANES, m_pad), jnp.float32),
        grid=(n_tiles,),
        in_specs=[
            pl.BlockSpec((TM, D_IN), lambda i: (i, 0)),        # x tile (f32)
            pl.BlockSpec((D_IN, H), lambda i: (0, 0)),         # w1 (resident)
            pl.BlockSpec((1, H), lambda i: (0, 0)),            # b1 (resident)
            pl.BlockSpec((H, OUT_LANES), lambda i: (0, 0)),    # fused weight
            pl.BlockSpec((1, OUT_LANES), lambda i: (0, 0)),    # fused bias
        ],
        # lane-dense (8, TM) output blocks tiled along the batch axis
        out_specs=pl.BlockSpec((OUT_SUBLANES, TM), lambda i: (0, i)),
        compiler_params=pltpu.CompilerParams(
            dimension_semantics=("parallel",)),
    )(x, w1_bf, b1, wf_pad, bf_pad)

    # row 0 of the transposed slab -> the module's (B, 1) regressor output
    return out[0, :n_rows].reshape(n_rows, 1)


def make_params():
    # Deterministic parameter initialization (synthetic, not a checkpoint).
    k = jax.random.PRNGKey(0)
    k1, k2, k3, k4, k5, k6 = jax.random.split(k, 6)
    w1 = jax.random.normal(k1, (D_IN, H), jnp.float32) * 0.05
    b1 = jax.random.normal(k2, (1, H), jnp.float32) * 0.01
    w2 = jax.random.normal(k3, (H, Z2), jnp.float32) * 0.05
    b2 = jax.random.normal(k4, (1, Z2), jnp.float32) * 0.01
    wr = jax.random.normal(k5, (Z, 1), jnp.float32) * 0.05
    br = jax.random.normal(k6, (1, 1), jnp.float32) * 0.01
    return w1, b1, w2, b2, wr, br


def reference_forward(x, params):
    # Pure-JAX f32 reference of the ORIGINAL (unfused) module semantics.
    w1, b1, w2, b2, wr, br = params
    h = jnp.maximum(x @ w1 + b1, 0.0)
    mu_logvar = (h @ w2 + b2).reshape(-1, 2, Z)
    mu = mu_logvar[:, 0, :]
    return mu @ wr + br


if __name__ == "__main__":
    params = make_params()
    fused = fuse_params(params)            # one-time preprocessing (hoisted)

    kx = jax.random.split(jax.random.PRNGKey(0), 7)[-1]
    x = jax.random.normal(kx, (B, D_IN), jnp.float32)

    out = supervised_vae_forward(x, fused)
    out = jax.block_until_ready(out)

    ref = reference_forward(x, params)
    assert out.shape == (B, 1), out.shape
    # bf16 first-matmul operands + the algebraic fold reassociate floats.
    assert jnp.allclose(out, ref, atol=2e-2, rtol=2e-2), (out, ref)

    print("KERNEL_OK")
</pallas_src>

<mosaic_0001>
module attributes {stable_mosaic.version = 11 : i64} {
  func.func @supervised_vae_kernel(%arg0: i32, %arg1: memref<128x256xf32, #tpu.memory_space<vmem>>, %arg2: memref<256x128xbf16, #tpu.memory_space<vmem>>, %arg3: memref<1x128xf32, #tpu.memory_space<vmem>>, %arg4: memref<128x128xf32, #tpu.memory_space<vmem>>, %arg5: memref<1x128xf32, #tpu.memory_space<vmem>>, %arg6: memref<8x128xf32, #tpu.memory_space<vmem>>) attributes {dimension_semantics = [#tpu.dimension_semantics<parallel>], iteration_bounds = array<i64: 2>, scalar_prefetch = 0 : i64, scratch_operands = 0 : i64, tpu.core_type = #tpu.core_type<tc>, window_params = [{transform_indices = @transform_0, window_bounds = array<i64: 128, 256>}, {pipeline_mode = #tpu.pipeline_mode<synchronous>, transform_indices = @transform_1, window_bounds = array<i64: 256, 128>}, {pipeline_mode = #tpu.pipeline_mode<synchronous>, transform_indices = @transform_2, window_bounds = array<i64: 1, 128>}, {pipeline_mode = #tpu.pipeline_mode<synchronous>, transform_indices = @transform_3, window_bounds = array<i64: 128, 128>}, {pipeline_mode = #tpu.pipeline_mode<synchronous>, transform_indices = @transform_4, window_bounds = array<i64: 1, 128>}, {transform_indices = @transform_5, window_bounds = array<i64: 8, 128>}]} {
    %c0 = arith.constant 0 : index
    %c0_0 = arith.constant 0 : index
    %0 = vector.load %arg1[%c0, %c0_0] : memref<128x256xf32, #tpu.memory_space<vmem>>, vector<128x256xf32>
    %1 = arith.truncf %0 : vector<128x256xf32> to vector<128x256xbf16>
    %c0_1 = arith.constant 0 : index
    %c0_2 = arith.constant 0 : index
    %2 = vector.load %arg2[%c0_1, %c0_2] : memref<256x128xbf16, #tpu.memory_space<vmem>>, vector<256x128xbf16>
    %cst = arith.constant dense<0.000000e+00> : vector<128x128xf32>
    %3 = tpu.matmul %1, %2, %cst {dimension_numbers = #tpu.dot_dimension_numbers<[1], [0], [0], [1], [0, 0, 1, 1], [], []>} : vector<128x256xbf16>, vector<256x128xbf16>, vector<128x128xf32> -> vector<128x128xf32>
    %c0_3 = arith.constant 0 : index
    %c0_4 = arith.constant 0 : index
    %4 = vector.load %arg3[%c0_3, %c0_4] : memref<1x128xf32, #tpu.memory_space<vmem>>, vector<1x128xf32>
    %5 = vector.broadcast %4 : vector<1x128xf32> to vector<128x128xf32>
    %6 = arith.addf %3, %5 : vector<128x128xf32>
    %cst_5 = arith.constant 0.000000e+00 : f32
    %7 = vector.broadcast %cst_5 : f32 to vector<128x128xf32>
    %8 = arith.maximumf %6, %7 : vector<128x128xf32>
    %c0_6 = arith.constant 0 : index
    %c0_7 = arith.constant 0 : index
    %9 = vector.load %arg4[%c0_6, %c0_7] : memref<128x128xf32, #tpu.memory_space<vmem>>, vector<128x128xf32>
    %cst_8 = arith.constant dense<0.000000e+00> : vector<128x128xf32>
    %10 = tpu.matmul %8, %9, %cst_8 {dimension_numbers = #tpu.dot_dimension_numbers<[1], [0], [0], [1], [0, 0, 1, 1], [], []>} : vector<128x128xf32>, vector<128x128xf32>, vector<128x128xf32> -> vector<128x128xf32>
    %c0_9 = arith.constant 0 : index
    %c0_10 = arith.constant 0 : index
    %11 = vector.load %arg5[%c0_9, %c0_10] : memref<1x128xf32, #tpu.memory_space<vmem>>, vector<1x128xf32>
    %12 = vector.broadcast %11 : vector<1x128xf32> to vector<128x128xf32>
    %13 = arith.addf %10, %12 : vector<128x128xf32>
    %14 = tpu.transpose %13, [1, 0] : vector<128x128xf32> -> vector<128x128xf32>
    %15 = vector.extract_strided_slice %14 {offsets = [0, 0], sizes = [8, 128], strides = [1, 1]} : vector<128x128xf32> to vector<8x128xf32>
    %c0_11 = arith.constant 0 : index
    %c0_12 = arith.constant 0 : index
    %16 = vector.load %arg6[%c0_11, %c0_12] : memref<8x128xf32, #tpu.memory_space<vmem>>, vector<8x128xf32>
    tpu.vector_store %arg6[%c0_11, %c0_12], %15 {strides = array<i32>} : memref<8x128xf32, #tpu.memory_space<vmem>>, vector<8x128xf32>,
    return
  }
  func.func @transform_0(%arg0: i32) -> (i32, i32) {
    %c0_i32 = arith.constant 0 : i32
    %c0_i32_0 = arith.constant 0 : i32
    return %arg0, %c0_i32 : i32, i32
  }
  func.func @transform_1(%arg0: i32) -> (i32, i32) {
    %c0_i32 = arith.constant 0 : i32
    %c0_i32_0 = arith.constant 0 : i32
    %c0_i32_1 = arith.constant 0 : i32
    return %c0_i32, %c0_i32_0 : i32, i32
  }
  func.func @transform_2(%arg0: i32) -> (i32, i32) {
    %c0_i32 = arith.constant 0 : i32
    %c0_i32_0 = arith.constant 0 : i32
    %c0_i32_1 = arith.constant 0 : i32
    return %c0_i32, %c0_i32_0 : i32, i32
  }
  func.func @transform_3(%arg0: i32) -> (i32, i32) {
    %c0_i32 = arith.constant 0 : i32
    %c0_i32_0 = arith.constant 0 : i32
    %c0_i32_1 = arith.constant 0 : i32
    return %c0_i32, %c0_i32_0 : i32, i32
  }
  func.func @transform_4(%arg0: i32) -> (i32, i32) {
    %c0_i32 = arith.constant 0 : i32
    %c0_i32_0 = arith.constant 0 : i32
    %c0_i32_1 = arith.constant 0 : i32
    return %c0_i32, %c0_i32_0 : i32, i32
  }
  func.func @transform_5(%arg0: i32) -> (i32, i32) {
    %c0_i32 = arith.constant 0 : i32
    %c0_i32_0 = arith.constant 0 : i32
    return %c0_i32, %arg0 : i32, i32
  }
}

</mosaic_0001>

<bundles_post_ra>
// kernel: tpu_custom_call.1
= control target key start
LH: loop header
LB: loop body
LE: loop exit
PB: predicated region body
PF: predicated region fallthrough
CT: control target
= control target key end

     0   :  { %10 = vsyncpa [#allocation3], 0  ;;  %s1583_s0 = inlined_call_operand.hbm [shape: f32[256,256], index: 0, kind: input, shape index: {}]   ;;  %s1584_s1 = inlined_call_operand.hbm [shape: bf16[256,128], index: 1, kind: input, shape index: {}]   ;;  %s1585_s2 = inlined_call_operand.vmem [shape: f32[1,128], index: 2, kind: input, shape index: {}]   ;;  %s1586_s3 = inlined_call_operand.hbm [shape: f32[128,128], index: 3, kind: input, shape index: {}]   ;;  %s1587_s4 = inlined_call_operand.vmem [shape: f32[1,128], index: 4, kind: input, shape index: {}]   ;;  %s1588_s5 = inlined_call_operand.hbm [shape: f32[8,256], index: 5, kind: output, shape index: {}]  }
   0x1   :  { %12 = vsyncpa [#allocation3 + $0x1], 0 }
   0x2   :  { %13 = vsyncpa [#allocation6], 0 }
   0x3   :  { %14 = vsyncpa [#allocation4], 0 }
   0x4   :  { %16 = vsyncpa [#allocation4 + $0x1], 0  ;;  %s1344_s18 = smov 0   ;;  %s1346_s19 = smov 0  }
   0x5   :  { %s1348_s20 = smov 0   ;;  %s1350_s21 = smov 0  }
   0x6 LB: > { %s1365_s22 = sadd.s32 4294967295, %s1302_s21   ;;  %s875_s23 = sadd.s32 4294967294, %s1302_s21   ;;  %s1302_s21 = sphi %s1350_s21, %s1610_s21   ;;  %s1298_s20 = sphi %s1348_s20, %s1609_s20   ;;  %s1294_s19 = sphi %s1346_s19, %s1608_s19   ;;  %s1290_s18 = sphi %s1344_s18, %s1607_s18  }
   0x7   : > { %p42_p0 = scmp.ne.s32.totalorder %s1294_s19, %s1290_s18  ;;  %p1589_p1 = scmp.eq.s32.totalorder %s1365_s22, 0 }
   0x8   : > { %p156_p3 = scmp.eq.s32.totalorder %s875_s23, 1  ;;  %p876_p5 = scmp.ge.s32.totalorder %s1302_s21, 1 }
   0x9   : > { %p1374_p4 = por %p1589_p1, %p42_p0  ;;  %p163_p7 = scmp.lt.s32.totalorder %s1302_s21, 3 }
   0xa   : > { %p1379_p6 = por %p156_p3, %p42_p0  ;;  %s1304_s27 = smov [#allocation5]  }
   0xb   : > { %s1593_s24 = scalar_select %p1374_p4, 1, 0 }
   0xc   : > { %s1594_s25 = scalar_select %p1379_p6, 1, 0 }
   0xd   : > { %p1384_p8 = pnand %p876_p5, %p163_p7  ;;  %s175_s28 = sshll.u32 %s1304_s27, 4  ;;  %s176_s28 = int_to_ptr.vmem [resolvable:$true] %s175_s28 }
   0xe   : > { %s1305_s30 = smov [#allocation7]   ;;  %s1165_s7 = scalar_lea.vmem %s176_s28, 2048 }
   0xf   : > { %s1595_s26 = scalar_select %p1384_p8, 1, 0 }
  0x10   : > { %p1077_p9 = pneg %p1384_p8  ;;  %s191_s6 = sshll.u32 %s1305_s30, 4  ;;  %s192_s6 = int_to_ptr.vmem [resolvable:$true] %s191_s6 }
  0x11   : > { %p1166_p13 = scmp.ne.s32.totalorder %s176_s28, %s1165_s7  ;;  %p1173_p5 = scmp.lt.s32.totalorder %s176_s28, %s176_s28 }
  0x12   : > { %p1393_p11 = pnand %p1077_p9, %p1589_p1  ;;  %p1174_p7 = scmp.lt.s32.totalorder %s1165_s7, %s1165_s7 }
  0x14   : > { %p1156_p12 = pneg %p1393_p11  ;;  %p1175_p10 = por %p1174_p7, %p1173_p5 }
  0x16   : > { %p1168_p0 = pnand %p1166_p13, %p1156_p12 }
  0x18   : > { %p1169_p3 = pneg %p1168_p0 }
  0x1a   : > { %p1176_p9 = pnand %p1175_p10, %p1169_p3 }
  0x1c   : > { %1179 = shalt.err (!%p1176_p9)
}
  0x1d   : > { %s1306_s8 = smov 64   ;;  %s1307_s9 = smov 4  }
  0x1e   : > { %1080 = dma.hbm_to_vmem [thread:$0]  (!%p1393_p11), %s1584_s1, 2048, %s176_s28, [#allocation6], %s1306_s8, %s1306_s8, %s1307_s9  }
  0x1f   : > { %s1191_s12 = scalar_lea.vmem %s192_s6, 2048  ;;  %p1199_p2 = scmp.lt.s32.totalorder %s192_s6, %s192_s6 }
  0x20   : > { %p1192_p1 = scmp.ne.s32.totalorder %s192_s6, %s1191_s12  ;;  %p1200_p6 = scmp.lt.s32.totalorder %s1191_s12, %s1191_s12 }
  0x22   : > { %p1194_p13 = pnand %p1192_p1, %p1156_p12  ;;  %p1201_p5 = por %p1200_p6, %p1199_p2 }
  0x24   : > { %p1195_p0 = pneg %p1194_p13 }
  0x26   : > { %p1202_p10 = pnand %p1201_p5, %p1195_p0 }
  0x28   : > { %1205 = shalt.err (!%p1202_p10)
}
  0x29   : > { %s1308_s13 = smov 128   ;;  %s1309_s14 = smov 8  }
  0x2a   : > { %1083 = dma.hbm_to_vmem [thread:$0]  (!%p1393_p11), %s1586_s3, 2048, %s192_s6, [#allocation6], %s1308_s13, %s1308_s13, %s1309_s14  }
  0x2b   : > { %s1416_s17 = sadd.s32 1, %s1302_s21   ;;  %s29_s27 = sadd.s32 1, %s1298_s20 }
  0x2c   : > { %s26_s23 = ssub.s32 %s1302_s21, %s1416_s17  ;;  %p36_p2 = scmp.ne.s32.totalorder %s1298_s20, %s1294_s19 }
  0x2d   : > { %p27_p1 = scmp.eq.s32.totalorder %s26_s23, 0  ;;  %p37_p6 = scmp.eq.s32.totalorder %s1302_s21, 0 }
  0x2e   : > { %p1597_p3 = scmp.eq.s32.totalorder %s1365_s22, 1  ;;  %p1094_p9 = scmp.lt.s32.totalorder %s1302_s21, 2 }
  0x2f   : > { %s1425_s28 = scalar_select %p27_p1, %s1298_s20, %s29_s27  }
  0x30   : > { %p38_p12 = por %p37_p6, %p36_p2  ;;  %p1429_p7 = por %p1597_p3, %p36_p2 }
  0x31   : > { %s208_s29 = sand.u32 1, %s1298_s20   ;;  %s912_s6 = sshll.u32 %s1302_s21, 12 }
  0x32   : > { %s1598_s30 = scalar_select %p1429_p7, 1, 0 }
  0x33   : > { %s880_s7 = sshll.u32 %s208_s29, 8  ;;  %s1439_s10 = scalar_lea.hbm %s1583_s0, %s912_s6 }
  0x34   : > { %s212_s11 = scalar_lea.vmem [#allocation2], %s880_s7  ;;  %p1443_p11 = pnand %p1094_p9, %p38_p12 }
  0x35   : > { %s220_s12 = sshll.u32 %s212_s11, 4  ;;  %s1447_s14 = scalar_lea.sflag [#allocation3], %s208_s29  ;;  %s1441_s12 = int_to_ptr.vmem [resolvable:$true] %s220_s12 }
  0x36   : > { %s1206_s15 = scalar_lea.hbm %s1439_s10, 4096  ;;  %p1208_p0 = pneg %p1443_p11 }
  0x37   : > { %p1207_p13 = scmp.ne.s32.totalorder %s1439_s10, %s1206_s15  ;;  %s1211_s27 = scalar_lea.hbm %s1583_s0, 8192 }
  0x38   : > { %p1212_p1 = scmp.lt.s32.totalorder %s1439_s10, %s1583_s0  ;;  %p1213_p2 = scmp.lt.s32.totalorder %s1211_s27, %s1206_s15 }
  0x39   : > { %p1209_p5 = pnand %p1208_p0, %p1207_p13 }
  0x3a   : > { %p1214_p6 = por %p1213_p2, %p1212_p1 }
  0x3b   : > { %p1210_p10 = pneg %p1209_p5 }
  0x3d   : > { %p1215_p12 = pnand %p1214_p6, %p1210_p10 }
  0x3f   : > { %1218 = shalt.err (!%p1215_p12)
}
  0x40   : > { %s1219_s29 = scalar_lea.vmem %s1441_s12, 4096  ;;  %s1310_s8 = smov [#allocation2]  }
  0x41   : > { %p1220_p3 = scmp.ne.s32.totalorder %s1441_s12, %s1219_s29  ;;  %s1224_s9 = sshll.u32 %s1310_s8, 4  ;;  %s1225_s9 = int_to_ptr.vmem [resolvable:$false] %s1224_s9 }
  0x42   : > { %s1226_s11 = scalar_lea.vmem %s1225_s9, 8192  ;;  %p1227_p5 = scmp.lt.s32.totalorder %s1441_s12, %s1225_s9 }
  0x43   : > { %p1222_p9 = pnand %p1220_p3, %p1208_p0  ;;  %p1228_p7 = scmp.lt.s32.totalorder %s1226_s11, %s1219_s29 }
  0x45   : > { %p1223_p13 = pneg %p1222_p9  ;;  %p1229_p4 = por %p1228_p7, %p1227_p5 }
  0x47   : > { %p1230_p8 = pnand %p1229_p4, %p1223_p13 }
  0x49   : > { %1233 = shalt.err (!%p1230_p8)
}
  0x4a   : > { %s1311_s15 = smov 256   ;;  %s1312_s16 = smov 16  }
  0x4b   : > { %1087 = dma.hbm_to_vmem [thread:$0]  (!%p1443_p11), %s1439_s10, 4096, %s1441_s12, %s1447_s14, %s1311_s15, %s1311_s15, %s1312_s16  }
  0x4c   : > { %p1600_p0 = scmp.ne.s32.totalorder %s1595_s26, 0 }
  0x4d   : > { %s1471_s23 = sand.u32 (!%p1600_p0), 1, %s1294_s19   ;;  %p1601_p4 = scmp.ne.s32.totalorder (!%p1600_p0), %s1593_s24, 0 }
  0x4e   : > { %232 = sbr.rel (%p1600_p0) target bundleno = 660 (0x294), region = 40  ;;  %s885_s27 = sshll.u32 (!%p1600_p0), %s1471_s23, 8 }
  0x4f   : > { %s235_s7 = scalar_lea.sflag (!%p1600_p0), [#allocation3], %s1471_s23  ;;  %s1475_s6 = scalar_lea.vmem (!%p1600_p0), [#allocation2], %s885_s27 }
  0x53   : > { %1277 = dma.done.wait (%p1601_p4), %s235_s7, 4096  }
  0x54   : > { %1279 = vsyncadd (%p1601_p4), %s235_s7, 4294963200  ;;  %p1602_p8 = scmp.eq.s32.totalorder %s1365_s22, 0 }
  0x56   : > { %1281 = dma.done.wait (%p1602_p8), [#allocation6], 4096   ;;  %p1603_p7 = pmov %p1602_p8 }
  0x57   : > { %v1138_v0 = vld [vmem:[#allocation5 + $0x78] sm:$0xff]   ;;  %v1140_v2 = vld [vmem:[#allocation5 + $0x70] sm:$0xff]   ;;  %v1142_v4 = vld [vmem:[#allocation5 + $0x68] sm:$0xff]   ;;  %s888_s13 = sshll.u32 %s1471_s23, 3  ;;  %s908_s8 = sshll.u32 %s1365_s22, 7 }
  0x58   : > { %1283 = vsyncadd (%p1603_p7), [#allocation6], 4294963200  ;;  %v1139_v1 = vld [vmem:[#allocation5 + $0x38] sm:$0xff]   ;;  %913 = vmatprep.subr.bf16.mxu0 %v1138_v0  ;;  %v1141_v3 = vld [vmem:[#allocation5 + $0x30] sm:$0xff]   ;;  %s272_s14 = scalar_lea.vmem [#allocation8], %s888_s13  ;;  %s784_s15 = scalar_lea.hbm %s1588_s5, %s908_s8 }
  0x59   : > { %914 = vmatpush3.bf16.msra.mxu0 %v1139_v1  ;;  %v1143_v5 = vld [vmem:[#allocation5 + $0x28] sm:$0xff]   ;;  %v1144_v6 = vld [vmem:[#allocation5 + $0x60] sm:$0xff]   ;;  %v1146_v8 = vld [vmem:[#allocation5 + $0x58] sm:$0xff]   ;;  %s786_s29 = sshll.u32 %s272_s14, 4  ;;  %s773_s16 = scalar_lea.sflag [#allocation4], %s1471_s23  ;;  %s1543_s29 = int_to_ptr.vmem [resolvable:$true] %s786_s29 }
  0x5a   : > { %915 = vmatprep.subr.bf16.mxu0 %v1140_v2  ;;  %v1145_v7 = vld [vmem:[#allocation5 + $0x20] sm:$0xff]   ;;  %v1147_v9 = vld [vmem:[#allocation5 + $0x18] sm:$0xff]   ;;  %v1148_v10 = vld [vmem:[#allocation5 + $0x50] sm:$0xff]   ;;  %s1234_s27 = scalar_lea.vmem %s1543_s29, 128  ;;  %p1604_p10 = scmp.ne.s32.totalorder %s1598_s30, 0 }
  0x5b   : > { %v276_v11 = vld [vmem:[%s1475_s6 + $0x8] sm:$0xff]  ;;  %v278_v12 = vld [vmem:[%s1475_s6 + $0x18] sm:$0xff]  ;;  %v1149_v14 = vld [vmem:[#allocation5 + $0x10] sm:$0xff]   ;;  %p1235_p11 = scmp.ne.s32.totalorder %s1543_s29, %s1234_s27  ;;  %s1313_s7 = smov [#allocation8]  }
  0x5c   : > { %v308_v13 = vpack.c.bf16 %v278_v12, %v276_v11  ;;  %v1150_v15 = vld [vmem:[#allocation5 + $0x48] sm:$0xff]   ;;  %v1152_v17 = vld [vmem:[#allocation5 + $0x40] sm:$0xff]   ;;  %v586_v19 = vld [vmem:[#allocation7 + $0x78] sm:$0xff] }
  0x5d   : > { %916 = vmatpush3.bf16.msra.mxu0 %v1141_v3  ;;  %v1151_v16 = vld [vmem:[#allocation5 + $0x8] sm:$0xff]   ;;  %v1153_v18 = vld [vmem:[#allocation5] sm:$0xff]   ;;  %v277_v21 = vld [vmem:[%s1475_s6 + $0x10] sm:$0xff]  ;;  %1009 = vmatprep.subr.mxu1 %v586_v19  ;;  %p1236_p1 = pnand %p1235_p11, %p1604_p10 }
  0x5e   : > { %917 = vmatprep.subr.bf16.mxu0 %v1142_v4  ;;  %490 = vmatprep.mubr.bf16.mxu0 %v308_v13  ;;  %v275_v20 = vld [vmem:[%s1475_s6] sm:$0xff]  ;;  %v585_v22 = vld [vmem:[#allocation7 + $0x70] sm:$0xff]  ;;  %v280_v23 = vld [vmem:[%s1475_s6 + $0x28] sm:$0xff] }
  0x5f   : > { %v282_v24 = vld [vmem:[%s1475_s6 + $0x38] sm:$0xff]  ;;  %1010 = vmatpush3.msra.mxu1 %v586_v19  ;;  %v584_v25 = vld [vmem:[#allocation7 + $0x68] sm:$0xff]  ;;  %v307_v26 = vpack.c.bf16 %v277_v21, %v275_v20  ;;  %v583_v27 = vld [vmem:[#allocation7 + $0x60] sm:$0xff]  ;;  %p1237_p2 = pneg %p1236_p1 }
  0x60   : > { %1011 = vmatprep.subr.mxu1 %v585_v22  ;;  %v310_v28 = vpack.c.bf16 %v282_v24, %v280_v23  ;;  %v582_v29 = vld [vmem:[#allocation7 + $0x58] sm:$0xff]  ;;  %v581_v30 = vld [vmem:[#allocation7 + $0x50] sm:$0xff]  ;;  %v279_v31 = vld [vmem:[%s1475_s6 + $0x20] sm:$0xff] }
  0x61   : > { %918 = vmatpush3.bf16.msra.mxu0 %v1143_v5  ;;  %1012 = vmatpush3.msra.mxu1 %v585_v22  ;;  %v281_v32 = vld [vmem:[%s1475_s6 + $0x30] sm:$0xff]  ;;  %v284_v33 = vld [vmem:[%s1475_s6 + $0x48] sm:$0xff]  ;;  %v286_v34 = vld [vmem:[%s1475_s6 + $0x58] sm:$0xff] }
  0x62   : > { %919 = vmatprep.subr.bf16.mxu0 %v1144_v6  ;;  %1013 = vmatprep.subr.mxu1 %v584_v25  ;;  %v580_v35 = vld [vmem:[#allocation7 + $0x48] sm:$0xff]  ;;  %v309_v36 = vpack.c.bf16 %v281_v32, %v279_v31  ;;  %v579_v37 = vld [vmem:[#allocation7 + $0x40] sm:$0xff]  ;;  %v312_v38 = vpack.c.bf16 %v286_v34, %v284_v33  ;;  %v578_v39 = vld [vmem:[#allocation7 + $0x38] sm:$0xff] }
  0x63   : > { %1014 = vmatpush3.msra.mxu1 %v584_v25  ;;  %v577_v40 = vld [vmem:[#allocation7 + $0x30] sm:$0xff]  ;;  %v283_v41 = vld [vmem:[%s1475_s6 + $0x40] sm:$0xff]  ;;  %v288_v43 = vld [vmem:[%s1475_s6 + $0x68] sm:$0xff] }
  0x64   : > { %1015 = vmatprep.subr.mxu1 %v583_v27  ;;  %v285_v42 = vld [vmem:[%s1475_s6 + $0x50] sm:$0xff]  ;;  %v290_v44 = vld [vmem:[%s1475_s6 + $0x78] sm:$0xff]  ;;  %v287_v47 = vld [vmem:[%s1475_s6 + $0x60] sm:$0xff] }
  0x65   : > { %920 = vmatpush3.bf16.msra.mxu0 %v1145_v7  ;;  %1016 = vmatpush3.msra.mxu1 %v583_v27  ;;  %v311_v45 = vpack.c.bf16 %v285_v42, %v283_v41  ;;  %v314_v46 = vpack.c.bf16 %v290_v44, %v288_v43  ;;  %v289_v48 = vld [vmem:[%s1475_s6 + $0x70] sm:$0xff]  ;;  %v292_v49 = vld [vmem:[%s1475_s6 + $0x88] sm:$0xff]  ;;  %v294_v50 = vld [vmem:[%s1475_s6 + $0x98] sm:$0xff] }
  0x66   : > { %921 = vmatprep.subr.bf16.mxu0 %v1146_v8  ;;  %1017 = vmatprep.subr.mxu1 %v582_v29  ;;  %v313_v51 = vpack.c.bf16 %v289_v48, %v287_v47  ;;  %v316_v52 = vpack.c.bf16 %v294_v50, %v292_v49  ;;  %v291_v53 = vld [vmem:[%s1475_s6 + $0x80] sm:$0xff]  ;;  %v293_v54 = vld [vmem:[%s1475_s6 + $0x90] sm:$0xff]  ;;  %v296_v55 = vld [vmem:[%s1475_s6 + $0xa8] sm:$0xff] }
  0x67   : > { %1018 = vmatpush3.msra.mxu1 %v582_v29  ;;  %v298_v56 = vld [vmem:[%s1475_s6 + $0xb8] sm:$0xff]  ;;  %v315_v57 = vpack.c.bf16 %v293_v54, %v291_v53  ;;  %v295_v59 = vld [vmem:[%s1475_s6 + $0xa0] sm:$0xff]  ;;  %v297_v60 = vld [vmem:[%s1475_s6 + $0xb0] sm:$0xff] }
  0x68   : > { %1019 = vmatprep.subr.mxu1 %v581_v30  ;;  %v318_v58 = vpack.c.bf16 %v298_v56, %v296_v55  ;;  %v300_v61 = vld [vmem:[%s1475_s6 + $0xc8] sm:$0xff]  ;;  %v302_v62 = vld [vmem:[%s1475_s6 + $0xd8] sm:$0xff]  ;;  %v317_v63 = vpack.c.bf16 %v297_v60, %v295_v59  ;;  %v299_v1 = vld [vmem:[%s1475_s6 + $0xc0] sm:$0xff] }
  0x69   : > { %922 = vmatpush3.bf16.msra.mxu0 %v1147_v9  ;;  %1020 = vmatpush3.msra.mxu1 %v581_v30  ;;  %v320_v0 = vpack.c.bf16 %v302_v62, %v300_v61  ;;  %v301_v2 = vld [vmem:[%s1475_s6 + $0xd0] sm:$0xff]  ;;  %v304_v3 = vld [vmem:[%s1475_s6 + $0xe8] sm:$0xff]  ;;  %v306_v4 = vld [vmem:[%s1475_s6 + $0xf8] sm:$0xff] }
  0x6a   : > { %923 = vmatprep.subr.bf16.mxu0 %v1148_v10  ;;  %1021 = vmatprep.subr.mxu1 %v580_v35  ;;  %v319_v5 = vpack.c.bf16 %v301_v2, %v299_v1  ;;  %v322_v6 = vpack.c.bf16 %v306_v4, %v304_v3  ;;  %v303_v7 = vld [vmem:[%s1475_s6 + $0xe0] sm:$0xff]  ;;  %v305_v8 = vld [vmem:[%s1475_s6 + $0xf0] sm:$0xff]  ;;  %v576_v10 = vld [vmem:[#allocation7 + $0x28] sm:$0xff]  ;;  %s1238_s6 = sshll.u32 %s1313_s7, 4  ;;  %s1239_s6 = int_to_ptr.vmem [resolvable:$false] %s1238_s6 }
  0x6b   : > { %1022 = vmatpush3.msra.mxu1 %v580_v35  ;;  %v321_v9 = vpack.c.bf16 %v305_v8, %v303_v7  ;;  %v575_v11 = vld [vmem:[#allocation7 + $0x20] sm:$0xff]  ;;  %v574_v12 = vld [vmem:[#allocation7 + $0x18] sm:$0xff]  ;;  %v573_v13 = vld [vmem:[#allocation7 + $0x10] sm:$0xff]  ;;  %s1240_s22 = scalar_lea.vmem %s1239_s6, 256  ;;  %p1241_p6 = scmp.lt.s32.totalorder %s1543_s29, %s1239_s6 }
  0x6c   : > { %1023 = vmatprep.subr.mxu1 %v579_v37  ;;  %p1242_p12 = scmp.lt.s32.totalorder %s1240_s22, %s1234_s27 }
  0x6d   : > { %924 = vmatpush3.bf16.msra.mxu0 %v1149_v14  ;;  %1024 = vmatpush3.msra.mxu1 %v579_v37  ;;  %v572_v14 = vld [vmem:[#allocation7 + $0x8] sm:$0xff] }
  0x6e   : > { %925 = vmatprep.subr.bf16.mxu0 %v1150_v15  ;;  %1025 = vmatprep.subr.mxu1 %v578_v39  ;;  %v571_v15 = vld [vmem:[#allocation7] sm:$0xff]  ;;  %p1243_p3 = por %p1242_p12, %p1241_p6 }
  0x6f   : > { %1026 = vmatpush3.msra.mxu1 %v578_v39 }
  0x70   : > { %1027 = vmatprep.subr.mxu1 %v577_v40  ;;  %p1244_p9 = pnand %p1243_p3, %p1237_p2 }
  0x71   : > { %926 = vmatpush3.bf16.msra.mxu0 %v1151_v16  ;;  %1028 = vmatpush3.msra.mxu1 %v577_v40 }
  0x72   : > { %927 = vmatprep.subr.bf16.mxu0 %v1152_v17  ;;  %1029 = vmatprep.subr.mxu1 %v576_v10 }
  0x73   : > { %1030 = vmatpush3.msra.mxu1 %v576_v10 }
  0x74   : > { %1031 = vmatprep.subr.mxu1 %v575_v11 }
  0x75   : > { %928 = vmatpush3.bf16.msra.mxu0 %v1153_v18  ;;  %1032 = vmatpush3.msra.mxu1 %v575_v11  ;;  %v1520_v18 = vld [vmem:[%s1585_s2] ss:$0 sm:$0xff] }
  0x76   : > { %1033 = vmatprep.subr.mxu1 %v574_v12 }
  0x77   : > { %1034 = vmatpush3.msra.mxu1 %v574_v12 }
  0x78   : > { %491 = vmatmul.mubr.bf16.vlgmr.msra.gmra.mxu0 %v307_v26  ;;  %1035 = vmatprep.subr.mxu1 %v573_v13 }
  0x79   : > { %498 = vmatprep.mubr.bf16.mxu0 %v310_v28  ;;  %1036 = vmatpush3.msra.mxu1 %v573_v13 }
  0x7a   : > { %1037 = vmatprep.subr.mxu1 %v572_v14 }
  0x7b   : > { %1038 = vmatpush3.msra.mxu1 %v572_v14 }
  0x7c   : > { %1039 = vmatprep.subr.mxu1 %v571_v15 }
  0x7d   : > { %1040 = vmatpush3.msra.mxu1 %v571_v15 }
  0x80   : > { %499 = vmatmul.mubr.bf16.gmra.mxu0 %v309_v36 }
  0x81   : > { %506 = vmatprep.mubr.bf16.mxu0 %v312_v38 }
  0x88   : > { %507 = vmatmul.mubr.bf16.gmra.mxu0 %v311_v45 }
  0x89   : > { %514 = vmatprep.mubr.bf16.mxu0 %v314_v46 }
  0x90   : > { %515 = vmatmul.mubr.bf16.gmra.mxu0 %v313_v51 }
  0x91   : > { %522 = vmatprep.mubr.bf16.mxu0 %v316_v52 }
  0x98   : > { %523 = vmatmul.mubr.bf16.gmra.mxu0 %v315_v57 }
  0x99   : > { %530 = vmatprep.mubr.bf16.mxu0 %v318_v58 }
  0xa0   : > { %531 = vmatmul.mubr.bf16.gmra.mxu0 %v317_v63 }
  0xa1   : > { %538 = vmatprep.mubr.bf16.mxu0 %v320_v0 }
  0xa8   : > { %539 = vmatmul.mubr.bf16.gmra.mxu0 %v319_v5 }
  0xa9   : > { %546 = vmatprep.mubr.bf16.mxu0 %v322_v6 }
  0xb0   : > { %547 = vmatmul.mubr.bf16.gmra.mxu0 %v321_v9 }
 0x138   : > { %v929_v16 = vpop.f32.mrf.mxu0 }
 0x13a   : > { %v930_v17 = vpop.f32.mrf.mxu0 }
 0x13b   : > { %v931_v19 = vadd.f32 %v930_v17, %v929_v16 }
 0x13c   : > { %v932_v20 = vpop.f32.mrf.mxu0 }
 0x13d   : > { %v493_v21 = vadd.f32 %v931_v19, %v1520_v18 }
 0x13e   : > { %v933_v22 = vpop.f32.mrf.mxu0 }
 0x13f   : > { %v934_v23 = vadd.f32 %v933_v22, %v932_v20  ;;  %v555_v24 = vmax.f32 %v493_v21, 0.0 }
 0x140   : > { %v935_v25 = vpop.f32.mrf.mxu0 }
 0x141   : > { %v496_v26 = vadd.f32 %v934_v23, %v1520_v18  ;;  %1041 = vmatprep.mubr.f32.mxu1 %v555_v24 }
 0x142   : > { %v936_v27 = vpop.f32.mrf.mxu0 }
 0x143   : > { %v556_v28 = vmax.f32 %v496_v26, 0.0  ;;  %v937_v29 = vadd.f32 %v936_v27, %v935_v25 }
 0x144   : > { %v938_v30 = vpop.f32.mrf.mxu0 }
 0x145   : > { %v501_v31 = vadd.f32 %v937_v29, %v1520_v18  ;;  %1042 = vmatmul.mubr.f32.vlgmr.msra.gmra.mxu1 %v556_v28 }
 0x146   : > { %v939_v32 = vpop.f32.mrf.mxu0 }
 0x147   : > { %v557_v33 = vmax.f32 %v501_v31, 0.0  ;;  %v940_v34 = vadd.f32 %v939_v32, %v938_v30 }
 0x148   : > { %v941_v35 = vpop.f32.mrf.mxu0 }
 0x149   : > { %v504_v36 = vadd.f32 %v940_v34, %v1520_v18  ;;  %1044 = vmatprep.mubr.f32.mxu1 %v557_v33 }
 0x14a   : > { %v942_v37 = vpop.f32.mrf.mxu0 }
 0x14b   : > { %v558_v38 = vmax.f32 %v504_v36, 0.0  ;;  %v943_v39 = vadd.f32 %v942_v37, %v941_v35  ;;  %v906_v35 = vld [vmem:[%s1587_s4] ss:$0 sm:$0xff] }
 0x14c   : > { %v944_v40 = vpop.f32.mrf.mxu0 }
 0x14d   : > { %v509_v41 = vadd.f32 %v943_v39, %v1520_v18  ;;  %1045 = vmatmul.mubr.f32.gmra.mxu1 %v558_v38 }
 0x14e   : > { %v945_v42 = vpop.f32.mrf.mxu0 }
 0x14f   : > { %v559_v43 = vmax.f32 %v509_v41, 0.0  ;;  %v946_v44 = vadd.f32 %v945_v42, %v944_v40 }
 0x150   : > { %v947_v45 = vpop.f32.mrf.mxu0 }
 0x151   : > { %v512_v46 = vadd.f32 %v946_v44, %v1520_v18  ;;  %1047 = vmatprep.mubr.f32.mxu1 %v559_v43 }
 0x152   : > { %v948_v47 = vpop.f32.mrf.mxu0 }
 0x153   : > { %v560_v48 = vmax.f32 %v512_v46, 0.0  ;;  %v949_v49 = vadd.f32 %v948_v47, %v947_v45 }
 0x154   : > { %v950_v50 = vpop.f32.mrf.mxu0 }
 0x155   : > { %v517_v51 = vadd.f32 %v949_v49, %v1520_v18  ;;  %1048 = vmatmul.mubr.f32.gmra.mxu1 %v560_v48 }
 0x156   : > { %v951_v52 = vpop.f32.mrf.mxu0 }
 0x157   : > { %v561_v53 = vmax.f32 %v517_v51, 0.0  ;;  %v952_v54 = vadd.f32 %v951_v52, %v950_v50 }
 0x158   : > { %v953_v55 = vpop.f32.mrf.mxu0 }
 0x159   : > { %v520_v56 = vadd.f32 %v952_v54, %v1520_v18  ;;  %1050 = vmatprep.mubr.f32.mxu1 %v561_v53 }
 0x15a   : > { %v954_v57 = vpop.f32.mrf.mxu0 }
 0x15b   : > { %v562_v58 = vmax.f32 %v520_v56, 0.0  ;;  %v955_v59 = vadd.f32 %v954_v57, %v953_v55 }
 0x15c   : > { %v956_v60 = vpop.f32.mrf.mxu0 }
 0x15d   : > { %v525_v61 = vadd.f32 %v955_v59, %v1520_v18  ;;  %1051 = vmatmul.mubr.f32.gmra.mxu1 %v562_v58 }
 0x15e   : > { %v957_v62 = vpop.f32.mrf.mxu0 }
 0x15f   : > { %v563_v63 = vmax.f32 %v525_v61, 0.0  ;;  %v958_v0 = vadd.f32 %v957_v62, %v956_v60 }
 0x160   : > { %v959_v1 = vpop.f32.mrf.mxu0 }
 0x161   : > { %v528_v2 = vadd.f32 %v958_v0, %v1520_v18  ;;  %1053 = vmatprep.mubr.f32.mxu1 %v563_v63 }
 0x162   : > { %v960_v3 = vpop.f32.mrf.mxu0 }
 0x163   : > { %v564_v4 = vmax.f32 %v528_v2, 0.0  ;;  %v961_v5 = vadd.f32 %v960_v3, %v959_v1 }
 0x164   : > { %v962_v6 = vpop.f32.mrf.mxu0 }
 0x165   : > { %v533_v7 = vadd.f32 %v961_v5, %v1520_v18  ;;  %1054 = vmatmul.mubr.f32.gmra.mxu1 %v564_v4 }
 0x166   : > { %v963_v8 = vpop.f32.mrf.mxu0 }
 0x167   : > { %v565_v9 = vmax.f32 %v533_v7, 0.0  ;;  %v964_v10 = vadd.f32 %v963_v8, %v962_v6 }
 0x168   : > { %v965_v11 = vpop.f32.mrf.mxu0 }
 0x169   : > { %v536_v12 = vadd.f32 %v964_v10, %v1520_v18  ;;  %1056 = vmatprep.mubr.f32.mxu1 %v565_v9 }
 0x16a   : > { %v966_v13 = vpop.f32.mrf.mxu0 }
 0x16b   : > { %v566_v14 = vmax.f32 %v536_v12, 0.0  ;;  %v967_v15 = vadd.f32 %v966_v13, %v965_v11 }
 0x16c   : > { %v968_v16 = vpop.f32.mrf.mxu0 }
 0x16d   : > { %v541_v17 = vadd.f32 %v967_v15, %v1520_v18  ;;  %1057 = vmatmul.mubr.f32.gmra.mxu1 %v566_v14 }
 0x16e   : > { %v969_v19 = vpop.f32.mrf.mxu0 }
 0x16f   : > { %v567_v20 = vmax.f32 %v541_v17, 0.0  ;;  %v970_v21 = vadd.f32 %v969_v19, %v968_v16 }
 0x170   : > { %v971_v22 = vpop.f32.mrf.mxu0 }
 0x171   : > { %v544_v23 = vadd.f32 %v970_v21, %v1520_v18  ;;  %1059 = vmatprep.mubr.f32.mxu1 %v567_v20 }
 0x172   : > { %v972_v24 = vpop.f32.mrf.mxu0 }
 0x173   : > { %v568_v25 = vmax.f32 %v544_v23, 0.0  ;;  %v973_v26 = vadd.f32 %v972_v24, %v971_v22 }
 0x174   : > { %v974_v27 = vpop.f32.mrf.mxu0 }
 0x175   : > { %v549_v28 = vadd.f32 %v973_v26, %v1520_v18  ;;  %1060 = vmatmul.mubr.f32.gmra.mxu1 %v568_v25 }
 0x176   : > { %v975_v29 = vpop.f32.mrf.mxu0 }
 0x177   : > { %v569_v30 = vmax.f32 %v549_v28, 0.0  ;;  %v976_v31 = vadd.f32 %v975_v29, %v974_v27 }
 0x179   : > { %v552_v32 = vadd.f32 %v976_v31, %v1520_v18  ;;  %1062 = vmatprep.mubr.f32.mxu1 %v569_v30 }
 0x17b   : > { %v570_v33 = vmax.f32 %v552_v32, 0.0 }
 0x17d   : > { %1063 = vmatmul.mubr.f32.gmra.mxu1 %v570_v33 }
 0x205   : > { %v1043_v34 = vpop.f32.mrf.mxu1 }
 0x206   : > { %v666_v38 = vadd.f32 %v1043_v34, %v906_v35 }
 0x207   : > { %v660_v36 = vpop.f32.mrf.mxu1 }
 0x208   : > { %v661_v37 = vadd.f32 %v906_v35, %v660_v36 }
 0x20a   : > { %739 = vxpose.xlu0.b32.start [1/16] (narrow) %v661_v37, 8 }
 0x20d   : > { %v1046_v39 = vpop.f32.mrf.mxu1 }
 0x20e   : > { %740 = vxpose.xlu0.b32.cont [2/16] (narrow) %v666_v38, 8  ;;  %v676_v42 = vadd.f32 %v1046_v39, %v906_v35 }
 0x20f   : > { %v670_v40 = vpop.f32.mrf.mxu1 }
 0x210   : > { %v671_v41 = vadd.f32 %v906_v35, %v670_v40 }
 0x212   : > { %741 = vxpose.xlu0.b32.cont [3/16] (narrow) %v671_v41, 8 }
 0x215   : > { %v1049_v43 = vpop.f32.mrf.mxu1 }
 0x216   : > { %742 = vxpose.xlu0.b32.cont [4/16] (narrow) %v676_v42, 8  ;;  %v686_v45 = vadd.f32 %v1049_v43, %v906_v35 }
 0x217   : > { %v680_v18 = vpop.f32.mrf.mxu1 }
 0x218   : > { %v681_v44 = vadd.f32 %v906_v35, %v680_v18 }
 0x21a   : > { %743 = vxpose.xlu0.b32.cont [5/16] (narrow) %v681_v44, 8 }
 0x21d   : > { %v1052_v46 = vpop.f32.mrf.mxu1 }
 0x21e   : > { %744 = vxpose.xlu0.b32.cont [6/16] (narrow) %v686_v45, 8  ;;  %v696_v49 = vadd.f32 %v1052_v46, %v906_v35 }
 0x21f   : > { %v690_v47 = vpop.f32.mrf.mxu1 }
 0x220   : > { %v691_v48 = vadd.f32 %v906_v35, %v690_v47 }
 0x222   : > { %745 = vxpose.xlu0.b32.cont [7/16] (narrow) %v691_v48, 8 }
 0x225   : > { %v1055_v50 = vpop.f32.mrf.mxu1 }
 0x226   : > { %746 = vxpose.xlu0.b32.cont [8/16] (narrow) %v696_v49, 8  ;;  %v706_v53 = vadd.f32 %v1055_v50, %v906_v35 }
 0x227   : > { %v700_v51 = vpop.f32.mrf.mxu1 }
 0x228   : > { %v701_v52 = vadd.f32 %v906_v35, %v700_v51 }
 0x22a   : > { %747 = vxpose.xlu0.b32.cont [9/16] (narrow) %v701_v52, 8 }
 0x22d   : > { %v1058_v54 = vpop.f32.mrf.mxu1 }
 0x22e   : > { %748 = vxpose.xlu0.b32.cont [10/16] (narrow) %v706_v53, 8  ;;  %v716_v57 = vadd.f32 %v1058_v54, %v906_v35 }
 0x22f   : > { %v710_v55 = vpop.f32.mrf.mxu1 }
 0x230   : > { %v711_v56 = vadd.f32 %v906_v35, %v710_v55 }
 0x232   : > { %749 = vxpose.xlu0.b32.cont [11/16] (narrow) %v711_v56, 8 }
 0x235   : > { %v1061_v58 = vpop.f32.mrf.mxu1 }
 0x236   : > { %750 = vxpose.xlu0.b32.cont [12/16] (narrow) %v716_v57, 8  ;;  %v726_v61 = vadd.f32 %v1061_v58, %v906_v35 }
 0x237   : > { %v720_v59 = vpop.f32.mrf.mxu1 }
 0x238   : > { %v721_v60 = vadd.f32 %v906_v35, %v720_v59 }
 0x23a   : > { %751 = vxpose.xlu0.b32.cont [13/16] (narrow) %v721_v60, 8 }
 0x23d   : > { %v1064_v62 = vpop.f32.mrf.mxu1 }
 0x23e   : > { %752 = vxpose.xlu0.b32.cont [14/16] (narrow) %v726_v61, 8  ;;  %v736_v1 = vadd.f32 %v1064_v62, %v906_v35 }
 0x23f   : > { %v730_v63 = vpop.f32.mrf.mxu1 }
 0x240   : > { %v731_v0 = vadd.f32 %v906_v35, %v730_v63 }
 0x242   : > { %753 = vxpose.xlu0.b32.cont [15/16] (narrow) %v731_v0, 8 }
 0x246   : > { %754 = vxpose.xlu0.b32.end [16/16] (narrow) %v736_v1, 8 }
 0x286   : > { %v755_v2 = vpop.trf.xlu0 }
 0x287   : > { %771 = vst [vmem:[%s272_s14] sm:$0xff] %v755_v2 }
 0x288   : > { %1247 = shalt.err (!%p1244_p9)
}
 0x289   : > { %s1248_s24 = scalar_lea.hbm %s784_s15, 128  ;;  %s1252_s10 = scalar_lea.hbm %s1588_s5, 256 }
 0x28a   : > { %p1249_p13 = scmp.ne.s32.totalorder %s784_s15, %s1248_s24  ;;  %p1253_p4 = scmp.lt.s32.totalorder %s784_s15, %s1588_s5 }
 0x28b   : > { %p1254_p8 = scmp.lt.s32.totalorder %s1252_s10, %s1248_s24 }
 0x28c   : > { %p1250_p5 = pnand %p1249_p13, %p1604_p10 }
 0x28d   : > { %p1255_p7 = por %p1254_p8, %p1253_p4 }
 0x28e   : > { %p1251_p0 = pneg %p1250_p5 }
 0x290   : > { %p1256_p11 = pnand %p1255_p7, %p1251_p0 }
 0x292   : > { %1259 = shalt.err (!%p1256_p11)
}
 0x293   : > { %1075 = dma.vmem_to_hbm [thread:$0]  (%p1604_p10), %s1543_s29, 128, %s784_s15, %s773_s16  }
 0x294 PF: > { %s798_s14 = sand.u32 1, %s1290_s18   ;;  %p1605_p1 = scmp.ne.s32.totalorder %s1594_s25, 0 }
 0x295   : > { %p1606_p2 = scmp.ge.s32.totalorder %s1302_s21, 2  ;;  %s799_s8 = scalar_lea.sflag [#allocation4], %s798_s14 }
 0x297   : > { %p1089_p6 = pnand %p1606_p2, %p1605_p1 }
 0x299   : > { %p1090_p12 = pneg %p1089_p6 }
 0x29b   : > { %1285 = dma.done.wait (%p1090_p12), %s799_s8, 128  }
 0x29c   : > { %1287 = vsyncadd (%p1090_p12), %s799_s8, 4294967168  ;;  %p19_p3 = scmp.ge.s32.totalorder %s1416_s17, 4   ;;  %s1607_s18 = smov %s1294_s19 }
 0x29d   : > { %s1608_s19 = smov %s1298_s20  ;;  %s1609_s20 = smov %s1425_s28 }
 0x29e   : > { %s1610_s21 = smov %s1416_s17  ;;  %21 = sbr.rel (!%p19_p3) target bundleno = 6 (0x6), region = 93 }
 0x2a3   :  { %804 = vsyncpa [#allocation3], 1 }
 0x2a4   :  { %806 = vsyncpa [#allocation3 + $0x1], 1 }
 0x2a5   :  { %807 = vsyncpa [#allocation6], 1 }
 0x2a6   :  { %808 = vsyncpa [#allocation4], 1 }
 0x2a7   :  { %810 = vsyncpa [#allocation4 + $0x1], 1 }

</bundles_post_ra>
